<compile_context>
chip_gen: v7x
topology: tpu7x:2x2x1
jax: 0.10.0
libtpu: 0.0.40
codegen_flags: <defaults>
</compile_context>

<pallas_src>
import numpy as np
import jax
import jax.numpy as jnp
from jax.experimental import pallas as pl
from jax.experimental.pallas import tpu as pltpu

LANE = 128
_B_BUCKETS = (8, 64, 512)      # static batch-row buckets (avoid recompiles)


def _round_up(x, m):
    return ((x + m - 1) // m) * m


def _next_pow2(n):
    p = 1
    while p < n:
        p *= 2
    return p


def _bucket_rows(n):
    n = max(n, 1)
    for b in _B_BUCKETS:
        if n <= b:
            return b
    return _round_up(n, _B_BUCKETS[-1])


def _bucket_factors(n):
    return LANE * _next_pow2(max(1, -(-n // LANE)))


# ----------------------------------------------------------------------------
# Pure-Python glue reproducing Embed / get_factor_lst / batch construction
# ----------------------------------------------------------------------------
def get_factor_lst(extent):
    """All positive divisors of `extent` (standard auto_schedule helper)."""
    assert isinstance(extent, int) and extent >= 1
    return [f for f in range(1, extent + 1) if extent % f == 0]


def embed_factors_np(factor_lst, emb_dim, k=10):
    """Embed.forward: base-k digit expansion, truncated/zero-padded to emb_dim."""
    rows = []
    for factor in factor_lst:
        assert isinstance(factor, int) and factor >= 1
        tmp = []
        f = factor
        while f > 0:
            tmp.append(f % k)
            f = f // k
        cha = max(0, emb_dim - len(tmp))
        tmp = tmp[:emb_dim] + [0] * cha
        rows.append(tmp)
    return np.asarray(rows, dtype=np.float32)


def build_batch_np(lst, shape_dict, dim, length):
    batch = []
    for op_name, contents in lst:
        shape = shape_dict[op_name]
        assert len(shape) == dim and len(contents) == length
        batch.append(list(shape) + list(contents))
    return np.asarray(batch, dtype=np.float32)


def _pad2d_np(a, rows, cols):
    """Zero-pad a 2-D numpy array to (rows, cols) float32 (host side)."""
    a = np.asarray(a, dtype=np.float32)
    out = np.zeros((rows, cols), dtype=np.float32)
    out[: a.shape[0], : a.shape[1]] = a
    return out


# ----------------------------------------------------------------------------
# Pallas kernel: whole numeric forward pass (padded, static shapes)
# ----------------------------------------------------------------------------
def sasd_kernel(sizes_ref, batch_ref, w_axis_ref, b_axis_ref,
                emb_ref, w_fac_ref, b_fac_ref, value_ref, idx_ref):
    nb = sizes_ref[0]   # valid batch rows
    nf = sizes_ref[1]   # valid factor lanes

    # filtered = tanh(batch @ W_axis + b_axis)                  -> [B_pad, H_pad]
    # bf16 MXU operands, f32 accumulation; biases/tanh in f32.
    filtered = jnp.tanh(
        jnp.dot(batch_ref[...], w_axis_ref[...],
                preferred_element_type=jnp.float32) + b_axis_ref[...])

    # Padded rows produce tanh(b_axis) != 0 -> zero-mask them, then reduce over
    # the batch (sublane) axis BEFORE the factor contraction (sum is linear).
    row_ids = jax.lax.broadcasted_iota(jnp.int32, filtered.shape, 0)
    filtered = jnp.where(row_ids < nb, filtered, 0.0)
    filtered_sum = jnp.sum(filtered, axis=0, keepdims=True)      # -> [1, H_pad]

    # factor_feature = tanh(embedded @ W_factor + b_factor)     -> [F_pad, H_pad]
    factor_feature = jnp.tanh(
        jnp.dot(emb_ref[...], w_fac_ref[...],
                preferred_element_type=jnp.float32) + b_fac_ref[...])

    # s = filtered_sum · factor_featureᵀ (contract over H, no explicit .T)
    s = jax.lax.dot_general(
        filtered_sum, factor_feature,
        dimension_numbers=(((1,), (1,)), ((), ())),
        preferred_element_type=jnp.float32)                      # -> [1, F_pad]

    # mask padded factor lanes to -inf, softmax over factors
    lane_ids = jax.lax.broadcasted_iota(jnp.int32, s.shape, 1)
    s = jnp.where(lane_ids < nf, s, -jnp.inf)

    m = jnp.max(s, axis=-1, keepdims=True)
    e = jnp.exp(s - m)                                           # padded lanes -> 0
    denom = jnp.sum(e, axis=-1, keepdims=True)
    value_ref[...] = e * pl.reciprocal(denom, approx=True)       # lane-dense [1, F_pad]

    # argmax (first max, like torch.argmax) computed in-kernel -> SMEM scalar
    big = jnp.int32(np.iinfo(np.int32).max)
    idx_ref[0] = jnp.min(jnp.where(s == m, lane_ids, big))


@jax.jit
def sasd_forward(sizes, batch_p, w_axis_p, b_axis_p, emb_p, w_fac_p, b_fac_p):
    """Jitted forward: single pallas_call returning (softmax values, argmax)."""
    f_pad = emb_p.shape[0]
    vmem = pl.BlockSpec(memory_space=pltpu.MemorySpace.VMEM)
    smem = pl.BlockSpec(memory_space=pltpu.MemorySpace.SMEM)

    value_p, idx = pl.pallas_call(
        sasd_kernel,
        out_shape=(jax.ShapeDtypeStruct((1, f_pad), jnp.float32),
                   jax.ShapeDtypeStruct((1,), jnp.int32)),
        in_specs=[smem, vmem, vmem, vmem, vmem, vmem, vmem],
        out_specs=(vmem, smem),
    )(sizes, batch_p, w_axis_p, b_axis_p, emb_p, w_fac_p, b_fac_p)
    return value_p, idx


# ----------------------------------------------------------------------------
# SASD module wrapper with deterministic parameters (pre-padded once)
# ----------------------------------------------------------------------------
class SASD:
    def __init__(self, dim, length, hidden, embedding, key):
        self.dim, self.length = dim, length
        self.hidden, self.embedding = hidden, embedding

        k1, k2, k3, k4 = jax.random.split(key, 4)
        in1 = dim + length
        # un-padded f32 parameters (kept for the pure-JAX reference check)
        self.w_axis_t = 0.1 * jax.random.normal(k1, (in1, hidden), jnp.float32)
        self.b_axis   = 0.1 * jax.random.normal(k2, (1, hidden), jnp.float32)
        self.w_fac_t  = 0.1 * jax.random.normal(k3, (embedding, hidden), jnp.float32)
        self.b_fac    = 0.1 * jax.random.normal(k4, (1, hidden), jnp.float32)

        # static lane-aligned padded parameters (zero pad: exact same math);
        # MXU operands pre-cast to bf16 once, biases stay f32.
        self.in_pad  = _round_up(in1, LANE)
        self.h_pad   = _round_up(hidden, LANE)
        self.emb_pad = _round_up(embedding, LANE)
        self.w_axis_p = jnp.asarray(
            _pad2d_np(np.asarray(self.w_axis_t), self.in_pad, self.h_pad),
            dtype=jnp.bfloat16)
        self.b_axis_p = jnp.asarray(
            _pad2d_np(np.asarray(self.b_axis), 1, self.h_pad), dtype=jnp.float32)
        self.w_fac_p = jnp.asarray(
            _pad2d_np(np.asarray(self.w_fac_t), self.emb_pad, self.h_pad),
            dtype=jnp.bfloat16)
        self.b_fac_p = jnp.asarray(
            _pad2d_np(np.asarray(self.b_fac), 1, self.h_pad), dtype=jnp.float32)

        # per-extent cache: extent -> (factors, n_fac, f_pad, emb_p device bf16)
        self._factor_cache = {}

    def _get_factor_entry(self, extent):
        ent = self._factor_cache.get(extent)
        if ent is None:
            factors = get_factor_lst(extent)
            n_fac = len(factors)
            f_pad = _bucket_factors(n_fac)
            emb_np = embed_factors_np(factors, self.embedding, k=10)
            emb_p = jax.device_put(
                jnp.asarray(_pad2d_np(emb_np, f_pad, self.emb_pad),
                            dtype=jnp.bfloat16))
            ent = (factors, n_fac, f_pad, emb_p)
            self._factor_cache[extent] = ent
        return ent

    def __call__(self, lst, shape_dict, extent, sampling=False):
        # --- python glue (data-dependent integer manipulation, as in PyTorch) ---
        if lst:
            batch_np = build_batch_np(lst, shape_dict, self.dim, self.length)
            n_rows = batch_np.shape[0]
        else:
            batch_np = np.zeros((1, self.dim + self.length), dtype=np.float32)
            n_rows = 0  # rows masked -> filtered_sum = 0 -> uniform softmax (torch branch)

        factors, n_fac, f_pad, emb_p = self._get_factor_entry(extent)

        # --- pad to STATIC bucketed, lane-aligned shapes (no recompiles) ---
        b_pad = _bucket_rows(n_rows)
        batch_p = jnp.asarray(_pad2d_np(batch_np, b_pad, self.in_pad),
                              dtype=jnp.bfloat16)
        sizes = jnp.asarray([n_rows, n_fac], dtype=jnp.int32)

        value_p, idx = sasd_forward(sizes, batch_p,
                                    self.w_axis_p, self.b_axis_p,
                                    emb_p, self.w_fac_p, self.b_fac_p)

        # TODO(synk): gumbel_softmax sampling branch (stochastic) not implemented;
        #             run with sampling=False (deterministic path).
        choice = factors[int(jax.device_get(idx)[0])]   # single 4-byte host sync
        value = value_p[0, :n_fac]                      # padded lanes hold exactly 0
        return value, choice


# ----------------------------------------------------------------------------
# Reference in plain JAX (mirrors the kernel's bf16 MXU / f32-accum numerics)
# ----------------------------------------------------------------------------
def sasd_ref(batch_vec, w_axis_t, b_axis, embedded, w_fac_t, b_fac):
    bf = jnp.bfloat16
    filtered = jnp.tanh(jnp.dot(batch_vec.astype(bf), w_axis_t.astype(bf),
                                preferred_element_type=jnp.float32) + b_axis)
    ff = jnp.tanh(jnp.dot(embedded.astype(bf), w_fac_t.astype(bf),
                          preferred_element_type=jnp.float32) + b_fac)
    s = jnp.sum(jnp.dot(filtered, ff.T, preferred_element_type=jnp.float32), axis=0)
    return jax.nn.softmax(s, axis=-1)


if __name__ == "__main__":
    dim, length, hidden, embedding = 4, 8, 32, 8
    extent = 16

    key = jax.random.PRNGKey(0)
    model = SASD(dim, length, hidden, embedding, key)

    # small deterministic inputs consistent with the module's forward signature
    lst = [
        ("op0", [1, 2, 3, 4, 5, 6, 7, 8]),
        ("op1", [2, 2, 2, 2, 4, 4, 4, 4]),
        ("op2", [8, 7, 6, 5, 4, 3, 2, 1]),
    ]
    shape_dict = {
        "op0": [16, 16, 3, 3],
        "op1": [32, 8, 1, 1],
        "op2": [4, 4, 8, 8],
    }

    value, choice = model(lst, shape_dict, extent, sampling=False)
    value = jax.block_until_ready(value)

    # sanity check vs pure-JAX reference (approx reciprocal + bf16 -> loose tol)
    factors = get_factor_lst(extent)
    batch_vec = jnp.asarray(build_batch_np(lst, shape_dict, dim, length))
    embedded = jnp.asarray(embed_factors_np(factors, embedding))
    ref = sasd_ref(batch_vec, model.w_axis_t, model.b_axis,
                   embedded, model.w_fac_t, model.b_fac)
    assert value.shape == ref.shape == (len(factors),)
    assert jnp.allclose(value, ref, atol=2e-3), (value, ref)
    assert abs(float(jnp.sum(value)) - 1.0) < 2e-3
    assert choice in factors
    # chosen factor must be (numerically) the max of the reference distribution
    assert float(jnp.max(ref)) - float(ref[factors.index(choice)]) < 1e-3

    # second call with a different extent / same buckets reuses the compile and
    # the per-extent cache (no new Mosaic compile, no re-embedding)
    value2, choice2 = model(lst, shape_dict, 24, sampling=False)
    jax.block_until_ready(value2)
    assert value2.shape == (len(get_factor_lst(24)),)
    assert abs(float(jnp.sum(value2)) - 1.0) < 2e-3
    _ = model(lst, shape_dict, 24, sampling=False)   # cache hit path

    # empty-batch branch (torch: filtered = zeros -> uniform softmax)
    value3, choice3 = model([], shape_dict, 12, sampling=False)
    jax.block_until_ready(value3)
    assert value3.shape == (len(get_factor_lst(12)),)
    assert abs(float(jnp.sum(value3)) - 1.0) < 2e-3
    assert choice3 == get_factor_lst(12)[0]

    print("KERNEL_OK")
</pallas_src>

<mosaic_0001>
module attributes {stable_mosaic.version = 11 : i64} {
  func.func @sasd_kernel(%arg0: memref<2xi32, #tpu.memory_space<smem>>, %arg1: memref<8x128xbf16, #tpu.memory_space<vmem>>, %arg2: memref<128x128xbf16, #tpu.memory_space<vmem>>, %arg3: memref<1x128xf32, #tpu.memory_space<vmem>>, %arg4: memref<128x128xbf16, #tpu.memory_space<vmem>>, %arg5: memref<128x128xbf16, #tpu.memory_space<vmem>>, %arg6: memref<1x128xf32, #tpu.memory_space<vmem>>, %arg7: memref<1x128xf32, #tpu.memory_space<vmem>>, %arg8: memref<1xi32, #tpu.memory_space<smem>>) attributes {dimension_semantics = [], scalar_prefetch = 0 : i64, scratch_operands = 0 : i64, tpu.core_type = #tpu.core_type<tc>} {
    %c0 = arith.constant 0 : index
    %0 = memref.load %arg0[%c0] : memref<2xi32, #tpu.memory_space<smem>>
    %c1 = arith.constant 1 : index
    %1 = memref.load %arg0[%c1] : memref<2xi32, #tpu.memory_space<smem>>
    %c0_0 = arith.constant 0 : index
    %c0_1 = arith.constant 0 : index
    %2 = vector.load %arg1[%c0_0, %c0_1] : memref<8x128xbf16, #tpu.memory_space<vmem>>, vector<8x128xbf16>
    %c0_2 = arith.constant 0 : index
    %c0_3 = arith.constant 0 : index
    %3 = vector.load %arg2[%c0_2, %c0_3] : memref<128x128xbf16, #tpu.memory_space<vmem>>, vector<128x128xbf16>
    %cst = arith.constant dense<0.000000e+00> : vector<8x128xf32>
    %4 = tpu.matmul %2, %3, %cst {dimension_numbers = #tpu.dot_dimension_numbers<[1], [0], [0], [1], [0, 0, 1, 1], [], []>} : vector<8x128xbf16>, vector<128x128xbf16>, vector<8x128xf32> -> vector<8x128xf32>
    %c0_4 = arith.constant 0 : index
    %c0_5 = arith.constant 0 : index
    %5 = vector.load %arg3[%c0_4, %c0_5] : memref<1x128xf32, #tpu.memory_space<vmem>>, vector<1x128xf32>
    %6 = vector.broadcast %5 : vector<1x128xf32> to vector<8x128xf32>
    %7 = arith.addf %4, %6 : vector<8x128xf32>
    %8 = math.tanh %7 : vector<8x128xf32>
    %9 = tpu.iota {dimensions = array<i32: 0>} : vector<8x128xi32>
    %10 = vector.broadcast %0 : i32 to vector<8x128xi32>
    %11 = arith.cmpi slt, %9, %10 : vector<8x128xi32>
    %cst_6 = arith.constant 0.000000e+00 : f32
    %12 = vector.broadcast %cst_6 : f32 to vector<8x128xf32>
    %13 = arith.select %11, %8, %12 : vector<8x128xi1>, vector<8x128xf32>
    %cst_7 = arith.constant dense<0.000000e+00> : vector<128xf32>
    %14 = vector.multi_reduction <add>, %13, %cst_7 [0] : vector<8x128xf32> to vector<128xf32>
    %15 = vector.shape_cast %14 : vector<128xf32> to vector<1x128xf32>
    %c0_8 = arith.constant 0 : index
    %c0_9 = arith.constant 0 : index
    %16 = vector.load %arg4[%c0_8, %c0_9] : memref<128x128xbf16, #tpu.memory_space<vmem>>, vector<128x128xbf16>
    %c0_10 = arith.constant 0 : index
    %c0_11 = arith.constant 0 : index
    %17 = vector.load %arg5[%c0_10, %c0_11] : memref<128x128xbf16, #tpu.memory_space<vmem>>, vector<128x128xbf16>
    %cst_12 = arith.constant dense<0.000000e+00> : vector<128x128xf32>
    %18 = tpu.matmul %16, %17, %cst_12 {dimension_numbers = #tpu.dot_dimension_numbers<[1], [0], [0], [1], [0, 0, 1, 1], [], []>} : vector<128x128xbf16>, vector<128x128xbf16>, vector<128x128xf32> -> vector<128x128xf32>
    %c0_13 = arith.constant 0 : index
    %c0_14 = arith.constant 0 : index
    %19 = vector.load %arg6[%c0_13, %c0_14] : memref<1x128xf32, #tpu.memory_space<vmem>>, vector<1x128xf32>
    %20 = vector.broadcast %19 : vector<1x128xf32> to vector<128x128xf32>
    %21 = arith.addf %18, %20 : vector<128x128xf32>
    %22 = math.tanh %21 : vector<128x128xf32>
    %cst_15 = arith.constant dense<0.000000e+00> : vector<1x128xf32>
    %23 = tpu.matmul %15, %22, %cst_15 {dimension_numbers = #tpu.dot_dimension_numbers<[1], [1], [0], [0], [0, 0, 1, 0], [], []>} : vector<1x128xf32>, vector<128x128xf32>, vector<1x128xf32> -> vector<1x128xf32>
    %24 = tpu.iota {dimensions = array<i32: 1>} : vector<1x128xi32>
    %25 = vector.broadcast %1 : i32 to vector<1x128xi32>
    %26 = arith.cmpi slt, %24, %25 : vector<1x128xi32>
    %cst_16 = arith.constant 0xFF800000 : f32
    %27 = vector.broadcast %cst_16 : f32 to vector<1x128xf32>
    %28 = arith.select %26, %23, %27 : vector<1x128xi1>, vector<1x128xf32>
    %cst_17 = arith.constant dense<0xFF800000> : vector<1xf32>
    %29 = vector.multi_reduction <maximumf>, %28, %cst_17 [1] : vector<1x128xf32> to vector<1xf32>
    %30 = vector.shape_cast %29 : vector<1xf32> to vector<1x1xf32>
    %31 = vector.broadcast %30 : vector<1x1xf32> to vector<1x128xf32>
    %32 = arith.subf %28, %31 : vector<1x128xf32>
    %33 = math.exp %32 : vector<1x128xf32>
    %cst_18 = arith.constant dense<0.000000e+00> : vector<1xf32>
    %34 = vector.multi_reduction <add>, %33, %cst_18 [1] : vector<1x128xf32> to vector<1xf32>
    %35 = vector.shape_cast %34 : vector<1xf32> to vector<1x1xf32>
    %36 = tpu.reciprocal %35 {approx = true} : vector<1x1xf32> -> vector<1x1xf32>
    %37 = vector.broadcast %36 : vector<1x1xf32> to vector<1x128xf32>
    %38 = arith.mulf %33, %37 : vector<1x128xf32>
    %c0_19 = arith.constant 0 : index
    %c0_20 = arith.constant 0 : index
    %39 = vector.load %arg7[%c0_19, %c0_20] : memref<1x128xf32, #tpu.memory_space<vmem>>, vector<1x128xf32>
    tpu.vector_store %arg7[%c0_19, %c0_20], %38 {strides = array<i32>} : memref<1x128xf32, #tpu.memory_space<vmem>>, vector<1x128xf32>,
    %40 = vector.broadcast %30 : vector<1x1xf32> to vector<1x128xf32>
    %41 = arith.cmpf oeq, %28, %40 : vector<1x128xf32>
    %c2147483647_i32 = arith.constant 2147483647 : i32
    %42 = vector.broadcast %c2147483647_i32 : i32 to vector<1x128xi32>
    %43 = arith.select %41, %24, %42 : vector<1x128xi1>, vector<1x128xi32>
    %44 = vector.shape_cast %43 : vector<1x128xi32> to vector<1x1x128xi32>
    %cst_21 = arith.constant dense<2147483647> : vector<1xi32>
    %45 = vector.multi_reduction <minsi>, %44, %cst_21 [1, 2] : vector<1x1x128xi32> to vector<1xi32>
    %46 = vector.shape_cast %45 : vector<1xi32> to vector<1x1x1xi32>
    %47 = vector.extract %46[0, 0, 0] : i32 from vector<1x1x1xi32>
    %c0_22 = arith.constant 0 : index
    %48 = memref.load %arg8[%c0_22] : memref<1xi32, #tpu.memory_space<smem>>
    memref.store %47, %arg8[%c0_22] : memref<1xi32, #tpu.memory_space<smem>>
    return
  }
}

</mosaic_0001>

<bundles_post_ra>
// kernel: sasd_forward.1
= control target key start
LH: loop header
LB: loop body
LE: loop exit
PB: predicated region body
PF: predicated region fallthrough
CT: control target
= control target key end

     0   :  { %14 = vsyncpa [#allocation5], 0  ;;  %s1192_s0 = inlined_call_operand.hbm [shape: s32[2], index: 0, kind: input, shape index: {}]   ;;  %s1193_s1 = inlined_call_operand.hbm [shape: bf16[8,128], index: 1, kind: input, shape index: {}]   ;;  %s1194_s2 = inlined_call_operand.hbm [shape: bf16[128,128], index: 2, kind: input, shape index: {}]   ;;  %s1195_s3 = inlined_call_operand.vmem [shape: f32[1,128], index: 3, kind: input, shape index: {}]   ;;  %s1196_s4 = inlined_call_operand.hbm [shape: bf16[128,128], index: 4, kind: input, shape index: {}]   ;;  %s1197_s5 = inlined_call_operand.hbm [shape: bf16[128,128], index: 5, kind: input, shape index: {}]   ;;  %s1198_s6 = inlined_call_operand.vmem [shape: f32[1,128], index: 6, kind: input, shape index: {}]   ;;  %s1199_s7 = inlined_call_operand.hbm [shape: f32[1,128], index: 7, kind: output, shape index: {0}]   ;;  %s1200_s8 = inlined_call_operand.hbm [shape: s32[1], index: 8, kind: output, shape index: {1}]  }
   0x1   :  { %15 = vsyncpa [#allocation3], 0 }
   0x2   :  { %16 = vsyncpa [#allocation9], 0 }
   0x3   :  { %17 = vsyncpa [#allocation12], 0 }
   0x4   :  { %18 = vsyncpa [#allocation4], 0 }
   0x5   :  { %19 = vsyncpa [#allocation6], 0  ;;  %s1015_s27 = smov [#allocation8]   ;;  %s873_s9 = scalar_lea.hbm %s1194_s2, 1024 }
   0x6   :  { %s43_s28 = sshll.u32 %s1015_s27, 4  ;;  %p874_p0 = scmp.ne.s32.totalorder %s1194_s2, %s873_s9  ;;  %s44_s28 = int_to_ptr.vmem [resolvable:$true] %s43_s28 }
   0x7   :  { %p877_p1 = scmp.lt.u32.totalorder %s873_s9, %s1194_s2 }
   0x9   :  { %p879_p2 = pnand %p877_p1, %p874_p0 }
   0xb   :  { %882 = shalt.err (!%p879_p2)
}
   0xc   :  { %s883_s14 = scalar_lea.vmem %s44_s28, 1024  ;;  %p888_p4 = scmp.lt.s32.totalorder %s44_s28, %s44_s28 }
   0xd   :  { %p884_p3 = scmp.ne.s32.totalorder %s44_s28, %s883_s14  ;;  %p889_p5 = scmp.lt.s32.totalorder %s883_s14, %s883_s14 }
   0xf   :  { %p890_p6 = por %p889_p5, %p888_p4 }
  0x11   :  { %p891_p7 = pnand %p890_p6, %p884_p3 }
  0x13   :  { %894 = shalt.err (!%p891_p7)
}
  0x14   :  { %s1016_s15 = smov 64   ;;  %s1017_s16 = smov 4  }
  0x15   :  { %49 = dma.hbm_to_vmem [thread:$0]  %s1194_s2, 1024, %s44_s28, [#allocation9], %s1016_s15, %s1016_s15, %s1017_s16  }
  0x16   :  { %s895_s21 = scalar_lea.hbm %s1192_s0, 16 }
  0x17   :  { %p896_p8 = scmp.ne.s32.totalorder %s1192_s0, %s895_s21  ;;  %p899_p9 = scmp.lt.u32.totalorder %s895_s21, %s1192_s0 }
  0x19   :  { %p901_p10 = pnand %p899_p9, %p896_p8 }
  0x1b   :  { %904 = shalt.err (!%p901_p10)
}
  0x1c   :  { %s1018_s26 = smov [#allocation2]   ;;  %s1019_s2 = smov [#allocation7]  }
  0x1d   :  { %27 = dma.hbm_to_smem %s1192_s0, 16, %s1018_s26, [#allocation5]  }
  0x1e   :  { %s34_s28 = sshll.u32 %s1019_s2, 4  ;;  %s1020_s30 = smov [#allocation10]   ;;  %s35_s28 = int_to_ptr.vmem [resolvable:$true] %s34_s28 }
  0x1f   :  { %s57_s9 = sshll.u32 %s1020_s30, 4  ;;  %s905_s12 = scalar_lea.hbm %s1193_s1, 64  ;;  %s1099_s9 = int_to_ptr.vmem [resolvable:$true] %s57_s9 }
  0x20   :  { %p906_p11 = scmp.ne.s32.totalorder %s1193_s1, %s905_s12  ;;  %p909_p12 = scmp.lt.u32.totalorder %s905_s12, %s1193_s1 }
  0x22   :  { %p911_p13 = pnand %p909_p12, %p906_p11 }
  0x24   :  { %914 = shalt.err (!%p911_p13)
}
  0x25   :  { %s915_s0 = scalar_lea.vmem %s35_s28, 64  ;;  %p920_p1 = scmp.lt.s32.totalorder %s35_s28, %s35_s28 }
  0x26   :  { %p916_p0 = scmp.ne.s32.totalorder %s35_s28, %s915_s0  ;;  %p921_p2 = scmp.lt.s32.totalorder %s915_s0, %s915_s0 }
  0x28   :  { %p922_p3 = por %p921_p2, %p920_p1 }
  0x2a   :  { %p923_p4 = pnand %p922_p3, %p916_p0 }
  0x2c   :  { %926 = shalt.err (!%p923_p4)
}
  0x2d   :  { %37 = dma.hbm_to_vmem [thread:$0]  %s1193_s1, 64, %s35_s28, [#allocation3]  }
  0x2e   :  { %s927_s23 = scalar_lea.hbm %s1196_s4, 1024 }
  0x2f   :  { %p928_p5 = scmp.ne.s32.totalorder %s1196_s4, %s927_s23  ;;  %p931_p6 = scmp.lt.u32.totalorder %s927_s23, %s1196_s4 }
  0x31   :  { %p933_p7 = pnand %p931_p6, %p928_p5 }
  0x33   :  { %936 = shalt.err (!%p933_p7)
}
  0x34   :  { %s937_s29 = scalar_lea.vmem %s1099_s9, 1024  ;;  %p942_p9 = scmp.lt.s32.totalorder %s1099_s9, %s1099_s9 }
  0x35   :  { %p938_p8 = scmp.ne.s32.totalorder %s1099_s9, %s937_s29  ;;  %p943_p10 = scmp.lt.s32.totalorder %s937_s29, %s937_s29 }
  0x37   :  { %p944_p11 = por %p943_p10, %p942_p9 }
  0x39   :  { %p945_p12 = pnand %p944_p11, %p938_p8 }
  0x3b   :  { %948 = shalt.err (!%p945_p12)
}
  0x3c   :  { %63 = dma.hbm_to_vmem [thread:$0]  %s1196_s4, 1024, %s1099_s9, [#allocation9], %s1016_s15, %s1016_s15, %s1017_s16  }
  0x3d   :  { %s1021_s28 = smov [#allocation11]   ;;  %s949_s12 = scalar_lea.hbm %s1197_s5, 1024 }
  0x3e   :  { %s69_s30 = sshll.u32 %s1021_s28, 4  ;;  %p950_p13 = scmp.ne.s32.totalorder %s1197_s5, %s949_s12  ;;  %s70_s30 = int_to_ptr.vmem [resolvable:$true] %s69_s30 }
  0x3f   :  { %p953_p0 = scmp.lt.u32.totalorder %s949_s12, %s1197_s5 }
  0x41   :  { %p955_p1 = pnand %p953_p0, %p950_p13 }
  0x43   :  { %958 = shalt.err (!%p955_p1)
}
  0x44   :  { %s959_s0 = scalar_lea.vmem %s70_s30, 1024  ;;  %p964_p3 = scmp.lt.s32.totalorder %s70_s30, %s70_s30 }
  0x45   :  { %p960_p2 = scmp.ne.s32.totalorder %s70_s30, %s959_s0  ;;  %p965_p4 = scmp.lt.s32.totalorder %s959_s0, %s959_s0 }
  0x47   :  { %p966_p5 = por %p965_p4, %p964_p3 }
  0x49   :  { %p967_p6 = pnand %p966_p5, %p960_p2 }
  0x4b   :  { %970 = shalt.err (!%p967_p6)
}
  0x4c   :  { %75 = dma.hbm_to_vmem [thread:$0]  %s1197_s5, 1024, %s70_s30, [#allocation12], %s1016_s15, %s1016_s15, %s1017_s16  }
  0x4d   :  { %1003 = dma.done.wait [#allocation5], 16  }
  0x4e   :  { %1004 = vsyncadd [#allocation5], 4294967280 }
  0x4f   :  { %1005 = dma.done.wait [#allocation3], 64  }
  0x50   :  { %1006 = vsyncadd [#allocation3], 4294967232 }
  0x51   :  { %1007 = dma.done.wait [#allocation9], 2048  }
  0x52   :  { %1008 = vsyncadd [#allocation9], 4294965248 }
  0x53   :  { %1009 = dma.done.wait [#allocation12], 1024  }
  0x54   :  { %1010 = vsyncadd [#allocation12], 4294966272 }
  0x55   :  { %93 = sfence }
  0x56   :  { %v811_v0 = vld [vmem:[#allocation8] sm:$0xff]   ;;  %v1022_v1 = vmov 0.0   ;;  %v812_v2 = vld [vmem:[#allocation8 + $0x8] sm:$0xff]   ;;  %vm1023_vm0 = vmmov 0   ;;  %v813_v3 = vld [vmem:[#allocation8 + $0x10] sm:$0xff]   ;;  %v1024_v26 = vmov 0.0|0.0  }
  0x57   :  { %686 = vmatprep.subr.bf16.mxu1 %v1022_v1  ;;  %702 = vmatprep.mubr.msk.bf16.mxu1 %vm1023_vm0, %v1022_v1  ;;  %v814_v4 = vld [vmem:[#allocation8 + $0x18] sm:$0xff]   ;;  %v815_v5 = vld [vmem:[#allocation8 + $0x20] sm:$0xff]   ;;  %v816_v6 = vld [vmem:[#allocation8 + $0x28] sm:$0xff]   ;;  %s95_s19 = sld [smem:[#allocation2]]  ;;  %vm544_vm3 = vcmask 1040384   ;;  %s1025_s20 = smov [#allocation13]  }
  0x58   :  { %687 = vmatpush3.bf16.msra.mxu1 %v811_v0  ;;  %770 = vmatprep.mubr.msk.f32.mxu0 %vm1023_vm0, %v1022_v1  ;;  %v817_v7 = vld [vmem:[#allocation8 + $0x30] sm:$0xff]   ;;  %v818_v8 = vld [vmem:[#allocation8 + $0x38] sm:$0xff]   ;;  %v819_v9 = vld [vmem:[#allocation11] sm:$0xff]   ;;  %s592_s21 = sshll.u32 %s1025_s20, 4  ;;  %s593_s21 = int_to_ptr.vmem [resolvable:$true] %s592_s21 }
  0x59   :  { %688 = vmatprep.subr.bf16.mxu1 %v1022_v1  ;;  %v97_v10 = vld [vmem:[#allocation7] sm:$0xf]  ;;  %v827_v11 = vld [vmem:[#allocation10] sm:$0xff]   ;;  %v820_v12 = vld [vmem:[#allocation11 + $0x8] sm:$0xff]   ;;  %773 = vmatprep.subr.bf16.mxu0 %v1024_v26  ;;  %s971_s22 = scalar_lea.vmem %s593_s21, 16  ;;  %s975_s23 = scalar_lea.vmem %s593_s21, 32 }
  0x5a   :  { %v821_v13 = vld [vmem:[#allocation11 + $0x10] sm:$0xff]   ;;  %v822_v14 = vld [vmem:[#allocation11 + $0x18] sm:$0xff]   ;;  %v823_v15 = vld [vmem:[#allocation11 + $0x20] sm:$0xff]   ;;  %p972_p7 = scmp.ne.s32.totalorder %s593_s21, %s971_s22  ;;  %p976_p8 = scmp.lt.s32.totalorder %s593_s21, %s593_s21 }
  0x5b   :  { %v824_v16 = vld [vmem:[#allocation11 + $0x28] sm:$0xff]   ;;  %v825_v17 = vld [vmem:[#allocation11 + $0x30] sm:$0xff]   ;;  %v826_v18 = vld [vmem:[#allocation11 + $0x38] sm:$0xff]   ;;  %p977_p9 = scmp.lt.s32.totalorder %s975_s23, %s971_s22 }
  0x5c   :  { %689 = vmatpush3.bf16.msra.mxu1 %v812_v2  ;;  %v828_v19 = vld [vmem:[#allocation10 + $0x8] sm:$0xff]   ;;  %v829_v20 = vld [vmem:[#allocation10 + $0x10] sm:$0xff]   ;;  %v830_v21 = vld [vmem:[#allocation10 + $0x18] sm:$0xff]  }
  0x5d   :  { %690 = vmatprep.subr.bf16.mxu1 %v1022_v1  ;;  %v831_v22 = vld [vmem:[#allocation10 + $0x20] sm:$0xff]   ;;  %v832_v23 = vld [vmem:[#allocation10 + $0x28] sm:$0xff]   ;;  %v833_v24 = vld [vmem:[#allocation10 + $0x30] sm:$0xff]   ;;  %p978_p10 = por %p977_p9, %p976_p8 }
  0x5e   :  { %v834_v25 = vld [vmem:[#allocation10 + $0x38] sm:$0xff]  }
  0x5f   :  { %v627_v31 = vld [vmem:[%s1198_s6] ss:$0 sm:$0xff]  ;;  %p979_p11 = pnand %p978_p10, %p972_p7 }
  0x60   :  { %691 = vmatpush3.bf16.msra.mxu1 %v813_v3 }
  0x61   :  { %692 = vmatprep.subr.bf16.mxu1 %v1022_v1 }
  0x64   :  { %693 = vmatpush3.bf16.msra.mxu1 %v814_v4 }
  0x65   :  { %694 = vmatprep.subr.bf16.mxu1 %v1022_v1 }
  0x68   :  { %695 = vmatpush3.bf16.msra.mxu1 %v815_v5 }
  0x69   :  { %696 = vmatprep.subr.bf16.mxu1 %v1022_v1 }
  0x6c   :  { %697 = vmatpush3.bf16.msra.mxu1 %v816_v6 }
  0x6d   :  { %698 = vmatprep.subr.bf16.mxu1 %v1022_v1 }
  0x70   :  { %699 = vmatpush3.bf16.msra.mxu1 %v817_v7 }
  0x71   :  { %700 = vmatprep.subr.bf16.mxu1 %v1022_v1 }
  0x74   :  { %701 = vmatpush3.bf16.msra.mxu1 %v818_v8 }
  0x75   :  { %706 = vmatprep.subr.bf16.mxu1 %v819_v9 }
  0x77   :  { %703 = vmatmul.mubr.bf16.vlgmr.msra.gmra.mrb[0].mxu1 %v97_v10 }
  0x78   :  { %707 = vmatpush3.bf16.msra.mxu1 %v819_v9  ;;  %722 = vmatprep.mubr.bf16.mxu1 %v827_v11 }
  0x79   :  { %708 = vmatprep.subr.bf16.mxu1 %v820_v12 }
  0x7c   :  { %709 = vmatpush3.bf16.msra.mxu1 %v820_v12 }
  0x7d   :  { %710 = vmatprep.subr.bf16.mxu1 %v821_v13 }
  0x80   :  { %711 = vmatpush3.bf16.msra.mxu1 %v821_v13 }
  0x81   :  { %712 = vmatprep.subr.bf16.mxu1 %v822_v14 }
  0x84   :  { %713 = vmatpush3.bf16.msra.mxu1 %v822_v14 }
  0x85   :  { %714 = vmatprep.subr.bf16.mxu1 %v823_v15 }
  0x88   :  { %715 = vmatpush3.bf16.msra.mxu1 %v823_v15 }
  0x89   :  { %716 = vmatprep.subr.bf16.mxu1 %v824_v16 }
  0x8c   :  { %717 = vmatpush3.bf16.msra.mxu1 %v824_v16 }
  0x8d   :  { %718 = vmatprep.subr.bf16.mxu1 %v825_v17 }
  0x90   :  { %719 = vmatpush3.bf16.msra.mxu1 %v825_v17 }
  0x91   :  { %720 = vmatprep.subr.bf16.mxu1 %v826_v18 }
  0x94   :  { %721 = vmatpush3.bf16.msra.mxu1 %v826_v18 }
  0x97   :  { %723 = vmatmul.mubr.bf16.vlgmr.msra.gmra.mrb[4].mxu1 %v828_v19  ;;  %v618_v19 = vld [vmem:[%s1195_s3] ss:$0 sm:$0xff]  ;;  %s617_s3 = sld [smem:[#allocation2 + $0x1]] }
  0x98   :  { %726 = vmatprep.mubr.bf16.mxu1 %v829_v20 }
  0x9f   :  { %727 = vmatmul.mubr.bf16.gmra.mrb[8].mxu1 %v830_v21 }
  0xa0   :  { %730 = vmatprep.mubr.bf16.mxu1 %v831_v22 }
  0xa7   :  { %731 = vmatmul.mubr.bf16.gmra.mrb[12].mxu1 %v832_v23 }
  0xa8   :  { %734 = vmatprep.mubr.bf16.mxu1 %v833_v24 }
  0xaf   :  { %735 = vmatmul.mubr.bf16.gmra.mrb[16].mxu1 %v834_v25 }
 0x14a   :  { %v1149_v27 = vpop.f32.mrb[0].mxu1 }
 0x14b   :  { %v704_v28 = vpop.f32.mrb[1].mxu1  ;;  %v204_v23 = vadd.f32 %v618_v19, %v1149_v27 }
 0x14c   :  { %v206_v29 = vpop.f32.mrb[2].mxu1  ;;  %v210_v28 = vlaneseq }
 0x14d   :  { %v705_v30 = vpop.f32.mrb[3].mxu1 }
 0x14e   :  { %v211_v29 = vshrl.u32 %v210_v28, 7  ;;  %v212_v30 = vstv %s95_s19 }
 0x150   :  { %vm213_vm1 = vcmp.lt.s32.totalorder %v211_v29, %v212_v30 }
 0x16a   :  { %v724_v32 = vpop.f32.mrb[4].mxu1 }
 0x16b   :  { %v399_v33 = vadd.f32 %v724_v32, %v627_v31  ;;  %v390_v34 = vpop.f32.mrb[5].mxu1 }
 0x16c   :  { %v391_v35 = vadd.f32 %v627_v31, %v390_v34  ;;  %v725_v36 = vpop.f32.mrb[6].mxu1 }
 0x16d   :  { %835 = vtanh.f32 %v399_v33  ;;  %v402_v37 = vadd.f32 %v725_v36, %v627_v31  ;;  %v393_v38 = vpop.f32.mrb[7].mxu1 }
 0x16e   :  { %837 = vtanh.f32 %v391_v35  ;;  %v394_v39 = vadd.f32 %v627_v31, %v393_v38  ;;  %v540_v38 = vand.u32 127, %v210_v28 }
 0x16f   :  { %839 = vtanh.f32 %v402_v37 }
 0x170   :  { %841 = vtanh.f32 %v394_v39  ;;  %v541_v39 = vstv %s617_s3 }
 0x171   :  { %vm542_vm2 = vcmp.lt.s32.totalorder %v540_v38, %v541_v39 }
 0x172   :  { %v728_v40 = vpop.f32.mrb[8].mxu1 }
 0x173   :  { %v415_v41 = vadd.f32 %v728_v40, %v627_v31  ;;  %v406_v42 = vpop.f32.mrb[9].mxu1 }
 0x174   :  { %v407_v43 = vadd.f32 %v627_v31, %v406_v42  ;;  %v729_v44 = vpop.f32.mrb[10].mxu1 }
 0x175   :  { %843 = vtanh.f32 %v415_v41  ;;  %v418_v45 = vadd.f32 %v729_v44, %v627_v31  ;;  %v409_v46 = vpop.f32.mrb[11].mxu1 }
 0x176   :  { %845 = vtanh.f32 %v407_v43  ;;  %v410_v47 = vadd.f32 %v627_v31, %v409_v46 }
 0x177   :  { %v836_v48 = vpop.eup %835  ;;  %847 = vtanh.f32 %v418_v45 }
 0x178   :  { %v838_v49 = vpop.eup %837  ;;  %849 = vtanh.f32 %v410_v47 }
 0x179   :  { %v840_v50 = vpop.eup %839 }
 0x17a   :  { %v842_v51 = vpop.eup %841  ;;  %v777_v52 = vpack.c.bf16 %v840_v50, %v836_v48  ;;  %v732_v53 = vpop.f32.mrb[12].mxu1 }
 0x17b   :  { %v774_v54 = vpack.c.bf16 %v842_v51, %v838_v49  ;;  %v431_v55 = vadd.f32 %v732_v53, %v627_v31  ;;  %v422_v56 = vpop.f32.mrb[13].mxu1 }
 0x17c   :  { %v423_v57 = vadd.f32 %v627_v31, %v422_v56  ;;  %v733_v58 = vpop.f32.mrb[14].mxu1 }
 0x17d   :  { %775 = vmatpush3.bf16.xpose.msra.mxu0 %v774_v54  ;;  %851 = vtanh.f32 %v431_v55  ;;  %v434_v59 = vadd.f32 %v733_v58, %v627_v31  ;;  %v425_v60 = vpop.f32.mrb[15].mxu1 }
 0x17e   :  { %776 = vmatprep.subr.bf16.mxu0 %v1024_v26  ;;  %853 = vtanh.f32 %v423_v57  ;;  %v426_v61 = vadd.f32 %v627_v31, %v425_v60 }
 0x17f   :  { %v844_v62 = vpop.eup %843  ;;  %855 = vtanh.f32 %v434_v59 }
 0x180   :  { %v846_v63 = vpop.eup %845  ;;  %857 = vtanh.f32 %v426_v61 }
 0x181   :  { %v848_v0 = vpop.eup %847 }
 0x182   :  { %v850_v1 = vpop.eup %849  ;;  %v783_v2 = vpack.c.bf16 %v848_v0, %v844_v62  ;;  %v736_v3 = vpop.f32.mrb[16].mxu1 }
 0x183   :  { %v780_v4 = vpack.c.bf16 %v850_v1, %v846_v63  ;;  %v447_v5 = vadd.f32 %v736_v3, %v627_v31  ;;  %v438_v6 = vpop.f32.mrb[17].mxu1 }
 0x184   :  { %v439_v7 = vadd.f32 %v627_v31, %v438_v6  ;;  %v737_v8 = vpop.f32.mrb[18].mxu1 }
 0x185   :  { %778 = vmatpush3.bf16.xpose.msra.mxu0 %v777_v52  ;;  %859 = vtanh.f32 %v447_v5  ;;  %v450_v9 = vadd.f32 %v737_v8, %v627_v31  ;;  %v441_v10 = vpop.f32.mrb[19].mxu1 }
 0x186   :  { %779 = vmatprep.subr.bf16.mxu0 %v1024_v26  ;;  %861 = vtanh.f32 %v439_v7  ;;  %v442_v11 = vadd.f32 %v627_v31, %v441_v10 }
 0x187   :  { %v852_v12 = vpop.eup %851  ;;  %863 = vtanh.f32 %v450_v9 }
 0x188   :  { %v854_v13 = vpop.eup %853  ;;  %865 = vtanh.f32 %v442_v11 }
 0x189   :  { %v856_v14 = vpop.eup %855  ;;  %867 = vtanh.f32 %v204_v23 }
 0x18a   :  { %v858_v15 = vpop.eup %857  ;;  %v789_v16 = vpack.c.bf16 %v856_v14, %v852_v12 }
 0x18b   :  { %v786_v17 = vpack.c.bf16 %v858_v15, %v854_v13 }
 0x18d   :  { %781 = vmatpush3.bf16.xpose.msra.mxu0 %v780_v4 }
 0x18e   :  { %782 = vmatprep.subr.bf16.mxu0 %v1024_v26 }
 0x18f   :  { %v860_v18 = vpop.eup %859 }
 0x190   :  { %v862_v20 = vpop.eup %861 }
 0x191   :  { %v864_v21 = vpop.eup %863 }
 0x192   :  { %v866_v22 = vpop.eup %865  ;;  %v795_v24 = vpack.c.bf16 %v864_v21, %v860_v18 }
 0x193   :  { %v792_v25 = vpack.c.bf16 %v866_v22, %v862_v20  ;;  %v868_v31 = vpop.eup %867 }
 0x194   :  { %v214_v32 = vsel %vm213_vm1, %v868_v31, 0.0 }
 0x195   :  { %784 = vmatpush3.bf16.xpose.msra.mxu0 %v783_v2  ;;  %v215_v27 = vrot.slane %v214_v32, 4 }
 0x196   :  { %785 = vmatprep.subr.bf16.mxu0 %v1024_v26 }
 0x197   :  { %v216_v33 = vadd.f32 %v215_v27, %v214_v32 }
 0x199   :  { %v217_v34 = vrot.slane %v216_v33, 2 }
 0x19b   :  { %v218_v35 = vadd.f32 %v217_v34, %v216_v33 }
 0x19d   :  { %787 = vmatpush3.bf16.xpose.msra.mxu0 %v786_v17  ;;  %v219_v36 = vrot.slane %v218_v35, 1 }
 0x19e   :  { %788 = vmatprep.subr.bf16.mxu0 %v1024_v26 }
 0x19f   :  { %v220_v37 = vadd.f32 %v219_v36, %v218_v35 }
 0x1a5   :  { %790 = vmatpush3.bf16.xpose.msra.mxu0 %v789_v16 }
 0x1a6   :  { %791 = vmatprep.subr.bf16.mxu0 %v1024_v26 }
 0x1ad   :  { %793 = vmatpush3.bf16.xpose.msra.mxu0 %v792_v25 }
 0x1ae   :  { %794 = vmatprep.subr.bf16.mxu0 %v1024_v26 }
 0x1b5   :  { %796 = vmatpush3.bf16.xpose.msra.mxu0 %v795_v24 }
 0x1bc   :  { %771 = vmatmul.mubr.f32.vlgmr.msra.gmra.mrb[0].mxu0 %v220_v37 }
 0x28f   :  { %v535_v40 = vpop.f32.mrb[0].mxu0 }
 0x290   :  { %v543_v41 = vsel %vm542_vm2, %v535_v40, -inf  ;;  %v772_v42 = vpop.f32.mrb[1].mxu0 }
 0x291   :  { %v545_v43 = vsel %vm544_vm3, %v543_v41, -inf }
 0x292   :  { %546 = vmax.xlane.f32.xlu0 %v545_v43 }
 0x31f   :  { %v547_v44 = vpop.xlane.xlu0 %546 }
 0x320   :  { %vm557_vm4 = vcmp.eq.f32.partialorder %v543_v41, %v547_v44  ;;  %v548_v48 = vsub.f32 %v543_v41, %v547_v44 }
 0x321   :  { %v558_v26 = vsel %vm557_vm4, %v540_v38, 2147483647 }
 0x322   :  { %v559_v45 = vsel %vm544_vm3, %v558_v26, 2147483647  ;;  %v549_v49 = vmul.f32 1.442695, %v548_v48 }
 0x323   :  { %v561_v46 = vshra.s32 %v559_v45, 16  ;;  %v560_v50 = vand.u32 65535, %v559_v45 }
 0x324   :  { %869 = vpow2.f32 %v549_v49 }
 0x325   :  { %v563_v47 = vcvt.s32.f32 %v561_v46  ;;  %v562_v52 = vcvt.s32.f32 %v560_v50 }
 0x327   :  { %564 = vmin.xlane.f32.xlu0 %v563_v47 }
 0x32e   :  { %v870_v54 = vpop.eup %869 }
 0x32f   :  { %v551_v55 = vsel %vm544_vm3, %v870_v54, 0.0 }
 0x3b4   :  { %v565_v51 = vpop.xlane.xlu0 %564 }
 0x3b5   :  { %vm566_vm5 = vcmp.eq.f32.partialorder %v563_v47, %v565_v51  ;;  %v571_v56 = vcvt.f32.s32 %v565_v51 }
 0x3b6   :  { %v567_v53 = vsel %vm566_vm5, %v562_v52, inf }
 0x3b7   :  { %568 = vmin.xlane.f32.xlu1 %v567_v53  ;;  %v572_v58 = vshll.u32 %v571_v56, 16 }
 0x3bb   :  { %552 = vadd.xlane.f32.xlu1 %v551_v55 }
 0x444   :  { %v569_v57 = vpop.xlane.xlu1 %568 }
 0x445   :  { %v570_v59 = vcvt.f32.s32 %v569_v57 }
 0x447   :  { %v573_v60 = vadd.s32 %v572_v58, %v570_v59 }
 0x448   :  { %v553_v61 = vpop.xlane.xlu1 %552 }
 0x449   :  { %v574_v62 = vrot.slane %v573_v60, 4  ;;  %871 = vrcp.f32 %v553_v61 }
 0x44b   :  { %vm575_vm6 = vcmp.lt.s32.totalorder %v573_v60, %v574_v62 }
 0x44c   :  { %v576_v63 = vsel %vm575_vm6, %v573_v60, %v574_v62 }
 0x44d   :  { %v577_v0 = vrot.slane %v576_v63, 2 }
 0x44f   :  { %vm578_vm7 = vcmp.lt.s32.totalorder %v576_v63, %v577_v0 }
 0x450   :  { %v579_v1 = vsel %vm578_vm7, %v576_v63, %v577_v0 }
 0x451   :  { %v580_v2 = vrot.slane %v579_v1, 1 }
 0x453   :  { %v872_v3 = vpop.eup %871  ;;  %vm581_vm8 = vcmp.lt.s32.totalorder %v579_v1, %v580_v2 }
 0x454   :  { %v582_v4 = vsel %vm581_vm8, %v579_v1, %v580_v2  ;;  %v555_v5 = vmul.f32 %v872_v3, %v870_v54 }
 0x455   :  { %797 = vpush %v582_v4 }
 0x456   :  { %556 = vst [vmem:[#allocation13] sm:$0x1] %v555_v5 }
 0x457   :  { %982 = shalt.err (!%p979_p11)
}
 0x458   :  { %s983_s26 = scalar_lea.hbm %s1199_s7, 16 }
 0x459   :  { %p984_p12 = scmp.ne.s32.totalorder %s1199_s7, %s983_s26  ;;  %p987_p13 = scmp.lt.u32.totalorder %s983_s26, %s1199_s7 }
 0x45b   :  { %p989_p0 = pnand %p987_p13, %p984_p12 }
 0x45d   :  { %992 = shalt.err (!%p989_p0)
}
 0x45e   :  { %595 = dma.vmem_to_hbm [thread:$0]  %s593_s21, 16, %s1199_s7, [#allocation4]  }
 0x45f   :  { %s993_s13 = scalar_lea.hbm %s1200_s8, 16 }
 0x460   :  { %p994_p1 = scmp.ne.s32.totalorder %s1200_s8, %s993_s13  ;;  %p997_p2 = scmp.lt.u32.totalorder %s993_s13, %s1200_s8 }
 0x462   :  { %p999_p3 = pnand %p997_p2, %p994_p1 }
 0x486   :  { %s798_s10 = spop %797 }
 0x487   :  { %585 = sst [smem:[#allocation14]] %s798_s10 }
 0x488   :  { %1002 = shalt.err (!%p999_p3)
}
 0x489   :  { %s1026_s4 = smov [#allocation14]  }
 0x48a   :  { %603 = dma.smem_to_hbm %s1026_s4, 16, %s1200_s8, [#allocation6]  }
 0x48b   :  { %1011 = dma.done.wait [#allocation4], 16  }
 0x48c   :  { %1012 = vsyncadd [#allocation4], 4294967280 }
 0x48d   :  { %1013 = dma.done.wait [#allocation6], 16  }
 0x48e   :  { %1014 = vsyncadd [#allocation6], 4294967280 }
 0x48f   :  { %610 = sfence }
 0x490   :  { %611 = vsyncpa [#allocation3], 1 }
 0x491   :  { %612 = vsyncpa [#allocation9], 1 }
 0x492   :  { %613 = vsyncpa [#allocation12], 1 }
 0x493   :  { %614 = vsyncpa [#allocation4], 1 }
 0x494   :  { %615 = vsyncpa [#allocation5], 1 }
 0x495   :  { %616 = vsyncpa [#allocation6], 1 }

</bundles_post_ra>
